<compile_context>
chip_gen: v7x
topology: tpu7x:2x2x1
jax: 0.10.0
libtpu: 0.0.40
codegen_flags: <defaults>
</compile_context>

<pallas_src>
import numpy as np
import jax
import jax.numpy as jnp
from jax.experimental import pallas as pl
from jax.experimental.pallas import tpu as pltpu


# ---------------------------------------------------------------------------
# 1-D resize matrix matching F.interpolate(mode="bicubic", antialias=True,
# align_corners=False)  (PyTorch AA path == Pillow, a = -0.5).
# ---------------------------------------------------------------------------
def _cubic_aa(x, a=-0.5):
    x = np.abs(x)
    return np.where(
        x < 1.0,
        ((a + 2.0) * x - (a + 3.0)) * x * x + 1.0,
        np.where(x < 2.0, (((x - 5.0) * x + 8.0) * x - 4.0) * a, 0.0),
    )


def bicubic_aa_resize_matrix(in_size: int, out_size: int) -> np.ndarray:
    """Matrix W (out_size, in_size) s.t. out = W @ in along one axis."""
    scale = in_size / out_size
    support = 2.0 * scale if scale >= 1.0 else 2.0
    invscale = 1.0 / scale if scale >= 1.0 else 1.0
    W = np.zeros((out_size, in_size), dtype=np.float64)
    for i in range(out_size):
        center = scale * (i + 0.5)
        xmin = max(int(center - support + 0.5), 0)
        xmax = min(int(center + support + 0.5), in_size)
        j = np.arange(xmin, xmax, dtype=np.float64)
        w = _cubic_aa((j - center + 0.5) * invscale)
        W[i, xmin:xmax] = w / w.sum()
    return W.astype(np.float32)


# ---------------------------------------------------------------------------
# Pallas kernel.  Grid = (G image-slabs [parallel], KC chunks of 2H [arbitrary]).
#   x_ref     : (H, TM*W)        packed images (batch folded into lanes)
#   w1h_ref   : (RH, H)          chunk kc of the H-axis upsample matrix
#   w1wbd_ref : (TM*W, TM*2W)    block-diagonal W-axis upsample
#   w2h_ref   : (Ho, RH)         chunk kc of the H-axis resize-to-out matrix
#   w2wbd_ref : (TM*2W, TM*Wo)   block-diagonal W-axis resize-to-out
#   o_ref     : (Ho, TM*Wo)
#   t1_ref    : (H, TM*2W)       scratch: W-upsampled slab (compute dtype)
#   acc_ref   : (Ho, TM*2W)      scratch: f32 accumulator over 2H chunks
# ---------------------------------------------------------------------------
def _cno_lrelu_kernel(x_ref, w1h_ref, w1wbd_ref, w2h_ref, w2wbd_ref, o_ref,
                      t1_ref, acc_ref):
    kc = pl.program_id(1)

    @pl.when(kc == 0)
    def _():
        acc_ref[...] = jnp.zeros_like(acc_ref)
        # Stage-1 W-axis upsample, done ONCE per image slab (W-first ordering:
        # cheaper than H-first whenever TM*W > H, and avoids recompute across
        # the 2H-row chunks).
        t1 = jnp.dot(x_ref[...], w1wbd_ref[...],
                     preferred_element_type=jnp.float32)            # (H, TM*2W)
        t1_ref[...] = t1.astype(t1_ref.dtype)

    # One RH-row chunk of the upsampled (2H, TM*2W) intermediate.
    t = jnp.dot(w1h_ref[...], t1_ref[...],
                preferred_element_type=jnp.float32)                  # (RH, TM*2W)
    t = jnp.maximum(t, 0.01 * t)                                     # LeakyReLU(0.01)
    acc_ref[...] += jnp.dot(w2h_ref[...], t.astype(w2h_ref.dtype),
                            preferred_element_type=jnp.float32)      # (Ho, TM*2W)

    @pl.when(kc == pl.num_programs(1) - 1)
    def _():
        y = jnp.dot(acc_ref[...].astype(w2wbd_ref.dtype), w2wbd_ref[...],
                    preferred_element_type=jnp.float32)              # (Ho, TM*Wo)
        o_ref[...] = y.astype(o_ref.dtype)


def _choose_tm(M, H, W, Wo, itemsize, target_lanes=128, vmem_budget_bytes=8 << 20):
    """Images per grid step.

    Uses min(W, Wo) so BOTH input and output slabs are >=128 lanes, never grows
    TM beyond the lane-density target (kron weights cost TM^2), and shrinks TM
    if the slab/weight footprint would blow the VMEM budget.
    """
    wmin = max(1, min(W, Wo))
    tm = max(1, -(-target_lanes // wmin))
    tm = max(1, min(tm, M))

    def footprint(t):
        kron1 = (t * W) * (t * 2 * W) * itemsize
        kron2 = (t * 2 * W) * (t * Wo) * itemsize
        t1 = H * (t * 2 * W) * itemsize
        interm = 2 * H * (t * 2 * W) * 4          # f32 live intermediate (worst case)
        return kron1 + kron2 + t1 + interm

    while tm > 1 and footprint(tm) > vmem_budget_bytes:
        tm -= 1
    return tm


def _vmem_capacity_bytes():
    """Hardware-derived VMEM capacity (64 MiB v7x, 128 MiB v5e/v6e)."""
    try:
        return int(pltpu.get_tpu_info().vmem_capacity_bytes)
    except Exception:
        return 128 << 20   # conservative fallback (e.g. interpret mode on CPU)


def cno_lrelu_2d(x, in_size, out_size, compute_dtype=jnp.bfloat16):
    """JAX/Pallas equivalent of CNO_LReLu(problem_dim=2, in_size, out_size).

    Operands are bf16 by default (native MXU on v5e/v6e/v7x); accumulation is
    always f32.  Pass compute_dtype=jnp.float32 for bit-closer-to-PyTorch math.
    """
    B, C, H, W = x.shape
    assert (H, W) == tuple(in_size), "input spatial dims must equal in_size"
    H2, W2 = 2 * H, 2 * W
    Ho, Wo = out_size
    cdt = jnp.dtype(compute_dtype)
    itemsize = cdt.itemsize

    # Deterministic "parameters": the fixed resize matrices.
    w1h = bicubic_aa_resize_matrix(H, H2)        # (2H, H)
    w1w = bicubic_aa_resize_matrix(W, W2)        # (2W, W)
    w2h = bicubic_aa_resize_matrix(H2, Ho)       # (Ho, 2H)
    w2w = bicubic_aa_resize_matrix(W2, Wo)       # (Wo, 2W)

    M = B * C
    TM = _choose_tm(M, H, W, Wo, itemsize)
    G = -(-M // TM)
    # v7x has 2 TensorCores: keep the parallel axis >=2 steps when that does
    # not sacrifice lane density on either slab.
    if G == 1 and M >= 2 and (-(-M // 2)) * min(W, Wo) >= 128:
        TM = -(-M // 2)
        G = -(-M // TM)
    Mp = G * TM

    # Chunk the 2H axis (bounds the live (2H, TM*2W) intermediate and the
    # stage-2 contraction; needed for large in_size, esp. under v7x VMEM).
    RH_SINGLE_MAX = 512
    if H2 <= RH_SINGLE_MAX:
        RH, KC, H2p = H2, 1, H2
    else:
        RH = 256                         # multiple of 128: BlockSpec lane rule on w2h
        KC = -(-H2 // RH)
        H2p = KC * RH
    if H2p != H2:                        # zero-pad: extra rows/cols contribute nothing
        w1h = np.pad(w1h, ((0, H2p - H2), (0, 0)))
        w2h = np.pad(w2h, ((0, 0), (0, H2p - H2)))

    # Block-diagonal W-axis weights: one lane-dense matmul handles the whole
    # TM-image slab -> no in-kernel reshape/transpose.
    w1wbd = np.kron(np.eye(TM, dtype=np.float32), w1w.T)   # (TM*W,  TM*2W)
    w2wbd = np.kron(np.eye(TM, dtype=np.float32), w2w.T)   # (TM*2W, TM*Wo)

    w1h_j = jnp.asarray(w1h, dtype=cdt)
    w1wbd_j = jnp.asarray(w1wbd, dtype=cdt)
    w2h_j = jnp.asarray(w2h, dtype=cdt)
    w2wbd_j = jnp.asarray(w2wbd, dtype=cdt)

    # Wrapper-side layout plumbing: fold TM images into the lane axis.
    xm = x.reshape(M, H, W)
    if Mp != M:
        xm = jnp.pad(xm, ((0, Mp - M), (0, 0), (0, 0)))
    xl = xm.reshape(G, TM, H, W).transpose(0, 2, 1, 3).reshape(G, H, TM * W)
    xl = xl.astype(cdt)

    # VMEM budget hint derived from the hardware capacity.
    out_itemsize = jnp.dtype(x.dtype).itemsize
    blk_in = H * TM * W * itemsize
    blk_out = Ho * TM * Wo * out_itemsize
    w_bytes = (H2p * H + (TM * W) * (TM * W2)
               + Ho * H2p + (TM * W2) * (TM * Wo)) * itemsize
    scratch = H * (TM * W2) * itemsize + Ho * (TM * W2) * 4
    interm = RH * (TM * W2) * 4
    est = 2 * (blk_in + blk_out + w_bytes) + scratch + 2 * interm
    cap = _vmem_capacity_bytes()
    vmem_limit = int(max(32 << 20, min(int(0.6 * cap), 2 * est)))

    out = pl.pallas_call(
        _cno_lrelu_kernel,
        out_shape=jax.ShapeDtypeStruct((G, Ho, TM * Wo), x.dtype),
        grid=(G, KC),
        in_specs=[
            pl.BlockSpec((None, H, TM * W), lambda g, kc: (g, 0, 0)),   # image slab
            pl.BlockSpec((RH, H), lambda g, kc: (kc, 0)),               # w1h row chunk
            pl.BlockSpec((TM * W, TM * W2), lambda g, kc: (0, 0)),      # kron up
            pl.BlockSpec((Ho, RH), lambda g, kc: (0, kc)),              # w2h col chunk
            pl.BlockSpec((TM * W2, TM * Wo), lambda g, kc: (0, 0)),     # kron out
        ],
        out_specs=pl.BlockSpec((None, Ho, TM * Wo), lambda g, kc: (g, 0, 0)),
        scratch_shapes=[
            pltpu.VMEM((H, TM * W2), cdt),           # stage-1 W-upsampled slab
            pltpu.VMEM((Ho, TM * W2), jnp.float32),  # stage-2 f32 accumulator
        ],
        compiler_params=pltpu.CompilerParams(
            dimension_semantics=("parallel", "arbitrary"),
            vmem_limit_bytes=vmem_limit,
        ),
    )(xl, w1h_j, w1wbd_j, w2h_j, w2wbd_j)

    # Unfold the lane-packed output back to (B, C, Ho, Wo).
    out = out.reshape(G, Ho, TM, Wo).transpose(0, 2, 1, 3).reshape(Mp, Ho, Wo)
    return out[:M].reshape(B, C, Ho, Wo)


# ---------------------------------------------------------------------------
# Pure-JAX reference (same resize matrices; checks batching/kron/layout/chunking).
# ---------------------------------------------------------------------------
def _reference(x, in_size, out_size):
    hp = jax.lax.Precision.HIGHEST
    H, W = in_size
    w1h_r = jnp.asarray(bicubic_aa_resize_matrix(H, 2 * H))
    w1w_r = jnp.asarray(bicubic_aa_resize_matrix(W, 2 * W))
    w2h_r = jnp.asarray(bicubic_aa_resize_matrix(2 * H, out_size[0]))
    w2w_r = jnp.asarray(bicubic_aa_resize_matrix(2 * W, out_size[1]))
    t = jnp.einsum("ah,bchw->bcaw", w1h_r, x.astype(jnp.float32), precision=hp)
    t = jnp.einsum("bcaw,vw->bcav", t, w1w_r, precision=hp)
    t = jnp.where(t >= 0.0, t, 0.01 * t)
    t = jnp.einsum("oa,bcav->bcov", w2h_r, t, precision=hp)
    return jnp.einsum("pv,bcov->bcop", w2w_r, t, precision=hp)


if __name__ == "__main__":
    key = jax.random.PRNGKey(0)
    k_small, k_big = jax.random.split(key)

    # ---- small config (default bf16 operands, f32 accumulation) ----
    B, C = 2, 4
    in_size, out_size = (16, 16), (12, 12)
    x = jax.random.normal(k_small, (B, C, *in_size), dtype=jnp.float32)

    y = jax.block_until_ready(cno_lrelu_2d(x, in_size, out_size))
    assert y.shape == (B, C, *out_size)
    assert y.dtype == jnp.float32
    ref = _reference(x, in_size, out_size)
    tol_bf16 = 3e-2 * float(jnp.max(jnp.abs(ref))) + 1e-3
    err = float(jnp.max(jnp.abs(y - ref)))
    assert err < tol_bf16, f"bf16 path: max abs err {err} (tol {tol_bf16})"

    # ---- same config, f32 compute path (tight tolerance) ----
    y32 = jax.block_until_ready(
        cno_lrelu_2d(x, in_size, out_size, compute_dtype=jnp.float32))
    err32 = float(jnp.max(jnp.abs(y32 - ref)))
    assert err32 < 2e-3, f"f32 path: max abs err {err32}"

    # ---- larger config exercising the chunked 2H-reduction path (KC > 1) ----
    B2, C2 = 2, 2
    in_size2, out_size2 = (288, 40), (64, 48)
    x2 = jax.random.normal(k_big, (B2, C2, *in_size2), dtype=jnp.float32)
    y2 = jax.block_until_ready(cno_lrelu_2d(x2, in_size2, out_size2))
    assert y2.shape == (B2, C2, *out_size2)
    ref2 = _reference(x2, in_size2, out_size2)
    tol2 = 3e-2 * float(jnp.max(jnp.abs(ref2))) + 1e-3
    err2 = float(jnp.max(jnp.abs(y2 - ref2)))
    assert err2 < tol2, f"chunked path: max abs err {err2} (tol {tol2})"

    print("KERNEL_OK")
</pallas_src>

<mosaic_0001>
module attributes {stable_mosaic.version = 11 : i64} {
  func.func @_cno_lrelu_kernel(%arg0: i32, %arg1: i32, %arg2: memref<1x16x128xbf16, #tpu.memory_space<vmem>>, %arg3: memref<32x16xbf16, #tpu.memory_space<vmem>>, %arg4: memref<128x256xbf16, #tpu.memory_space<vmem>>, %arg5: memref<12x32xbf16, #tpu.memory_space<vmem>>, %arg6: memref<256x96xbf16, #tpu.memory_space<vmem>>, %arg7: memref<1x12x96xf32, #tpu.memory_space<vmem>>, %arg8: memref<16x256xbf16, #tpu.memory_space<vmem>>, %arg9: memref<12x256xf32, #tpu.memory_space<vmem>>) attributes {dimension_semantics = [#tpu.dimension_semantics<parallel>, #tpu.dimension_semantics<arbitrary>], iteration_bounds = array<i64: 1, 1>, scalar_prefetch = 0 : i64, scratch_operands = 2 : i64, tpu.core_type = #tpu.core_type<tc>, window_params = [{transform_indices = @transform_0, window_bounds = array<i64: 1, 16, 128>}, {transform_indices = @transform_1, window_bounds = array<i64: 32, 16>}, {pipeline_mode = #tpu.pipeline_mode<synchronous>, transform_indices = @transform_2, window_bounds = array<i64: 128, 256>}, {transform_indices = @transform_3, window_bounds = array<i64: 12, 32>}, {pipeline_mode = #tpu.pipeline_mode<synchronous>, transform_indices = @transform_4, window_bounds = array<i64: 256, 96>}, {transform_indices = @transform_5, window_bounds = array<i64: 1, 12, 96>}]} {
    %c0_i32 = arith.constant 0 : i32
    %0 = arith.cmpi eq, %arg1, %c0_i32 : i32
    %1 = arith.extui %0 : i1 to i32
    %c0_i32_0 = arith.constant 0 : i32
    %2 = arith.cmpi ne, %1, %c0_i32_0 : i32
    scf.if %2 {
      %cst_14 = arith.constant 0.000000e+00 : f32
      %18 = vector.broadcast %cst_14 : f32 to vector<12x256xf32>
      %c0_15 = arith.constant 0 : index
      %c0_16 = arith.constant 0 : index
      %19 = vector.load %arg9[%c0_15, %c0_16] : memref<12x256xf32, #tpu.memory_space<vmem>>, vector<12x256xf32>
      tpu.vector_store %arg9[%c0_15, %c0_16], %18 {strides = array<i32>} : memref<12x256xf32, #tpu.memory_space<vmem>>, vector<12x256xf32>,
      %c0_17 = arith.constant 0 : index
      %c0_18 = arith.constant 0 : index
      %c0_19 = arith.constant 0 : index
      %20 = vector.load %arg2[%c0_17, %c0_18, %c0_19] : memref<1x16x128xbf16, #tpu.memory_space<vmem>>, vector<1x16x128xbf16>
      %21 = vector.shape_cast %20 : vector<1x16x128xbf16> to vector<16x128xbf16>
      %c0_20 = arith.constant 0 : index
      %c0_21 = arith.constant 0 : index
      %22 = vector.load %arg4[%c0_20, %c0_21] : memref<128x256xbf16, #tpu.memory_space<vmem>>, vector<128x256xbf16>
      %cst_22 = arith.constant dense<0.000000e+00> : vector<16x256xf32>
      %23 = tpu.matmul %21, %22, %cst_22 {dimension_numbers = #tpu.dot_dimension_numbers<[1], [0], [0], [1], [0, 0, 1, 1], [], []>} : vector<16x128xbf16>, vector<128x256xbf16>, vector<16x256xf32> -> vector<16x256xf32>
      %24 = arith.truncf %23 : vector<16x256xf32> to vector<16x256xbf16>
      %c0_23 = arith.constant 0 : index
      %c0_24 = arith.constant 0 : index
      %25 = vector.load %arg8[%c0_23, %c0_24] : memref<16x256xbf16, #tpu.memory_space<vmem>>, vector<16x256xbf16>
      tpu.vector_store %arg8[%c0_23, %c0_24], %24 {strides = array<i32>} : memref<16x256xbf16, #tpu.memory_space<vmem>>, vector<16x256xbf16>,
    } else {
    }
    %c0 = arith.constant 0 : index
    %c0_1 = arith.constant 0 : index
    %3 = vector.load %arg3[%c0, %c0_1] : memref<32x16xbf16, #tpu.memory_space<vmem>>, vector<32x16xbf16>
    %c0_2 = arith.constant 0 : index
    %c0_3 = arith.constant 0 : index
    %4 = vector.load %arg8[%c0_2, %c0_3] : memref<16x256xbf16, #tpu.memory_space<vmem>>, vector<16x256xbf16>
    %cst = arith.constant dense<0.000000e+00> : vector<32x256xf32>
    %5 = tpu.matmul %3, %4, %cst {dimension_numbers = #tpu.dot_dimension_numbers<[1], [0], [0], [1], [0, 0, 1, 1], [], []>} : vector<32x16xbf16>, vector<16x256xbf16>, vector<32x256xf32> -> vector<32x256xf32>
    %cst_4 = arith.constant 0.00999999977 : f32
    %6 = vector.broadcast %cst_4 : f32 to vector<32x256xf32>
    %7 = arith.mulf %6, %5 : vector<32x256xf32>
    %8 = arith.maximumf %5, %7 : vector<32x256xf32>
    %c0_5 = arith.constant 0 : index
    %c0_6 = arith.constant 0 : index
    %9 = vector.load %arg9[%c0_5, %c0_6] : memref<12x256xf32, #tpu.memory_space<vmem>>, vector<12x256xf32>
    %c0_7 = arith.constant 0 : index
    %c0_8 = arith.constant 0 : index
    %10 = vector.load %arg5[%c0_7, %c0_8] : memref<12x32xbf16, #tpu.memory_space<vmem>>, vector<12x32xbf16>
    %11 = arith.truncf %8 : vector<32x256xf32> to vector<32x256xbf16>
    %cst_9 = arith.constant dense<0.000000e+00> : vector<12x256xf32>
    %12 = tpu.matmul %10, %11, %cst_9 {dimension_numbers = #tpu.dot_dimension_numbers<[1], [0], [0], [1], [0, 0, 1, 1], [], []>} : vector<12x32xbf16>, vector<32x256xbf16>, vector<12x256xf32> -> vector<12x256xf32>
    %13 = arith.addf %9, %12 : vector<12x256xf32>
    %c0_10 = arith.constant 0 : index
    %c0_11 = arith.constant 0 : index
    %14 = vector.load %arg9[%c0_10, %c0_11] : memref<12x256xf32, #tpu.memory_space<vmem>>, vector<12x256xf32>
    tpu.vector_store %arg9[%c0_10, %c0_11], %13 {strides = array<i32>} : memref<12x256xf32, #tpu.memory_space<vmem>>, vector<12x256xf32>,
    %c0_i32_12 = arith.constant 0 : i32
    %15 = arith.cmpi eq, %arg1, %c0_i32_12 : i32
    %16 = arith.extui %15 : i1 to i32
    %c0_i32_13 = arith.constant 0 : i32
    %17 = arith.cmpi ne, %16, %c0_i32_13 : i32
    scf.if %17 {
      %c0_14 = arith.constant 0 : index
      %c0_15 = arith.constant 0 : index
      %18 = vector.load %arg9[%c0_14, %c0_15] : memref<12x256xf32, #tpu.memory_space<vmem>>, vector<12x256xf32>
      %19 = arith.truncf %18 : vector<12x256xf32> to vector<12x256xbf16>
      %c0_16 = arith.constant 0 : index
      %c0_17 = arith.constant 0 : index
      %20 = vector.load %arg6[%c0_16, %c0_17] : memref<256x96xbf16, #tpu.memory_space<vmem>>, vector<256x96xbf16>
      %cst_18 = arith.constant dense<0.000000e+00> : vector<12x96xf32>
      %21 = tpu.matmul %19, %20, %cst_18 {dimension_numbers = #tpu.dot_dimension_numbers<[1], [0], [0], [1], [0, 0, 1, 1], [], []>} : vector<12x256xbf16>, vector<256x96xbf16>, vector<12x96xf32> -> vector<12x96xf32>
      %c0_19 = arith.constant 0 : index
      %c0_20 = arith.constant 0 : index
      %c0_21 = arith.constant 0 : index
      %22 = vector.load %arg7[%c0_19, %c0_20, %c0_21] : memref<1x12x96xf32, #tpu.memory_space<vmem>>, vector<1x12x96xf32>
      %23 = vector.shape_cast %22 : vector<1x12x96xf32> to vector<12x96xf32>
      %24 = vector.shape_cast %21 : vector<12x96xf32> to vector<1x12x96xf32>
      tpu.vector_store %arg7[%c0_19, %c0_20, %c0_21], %24 {strides = array<i32>} : memref<1x12x96xf32, #tpu.memory_space<vmem>>, vector<1x12x96xf32>,
    } else {
    }
    return
  }
  func.func @transform_0(%arg0: i32, %arg1: i32) -> (i32, i32, i32) {
    %c0_i32 = arith.constant 0 : i32
    %c0_i32_0 = arith.constant 0 : i32
    %c0_i32_1 = arith.constant 0 : i32
    return %arg0, %c0_i32, %c0_i32_0 : i32, i32, i32
  }
  func.func @transform_1(%arg0: i32, %arg1: i32) -> (i32, i32) {
    %c0_i32 = arith.constant 0 : i32
    %c0_i32_0 = arith.constant 0 : i32
    return %arg1, %c0_i32 : i32, i32
  }
  func.func @transform_2(%arg0: i32, %arg1: i32) -> (i32, i32) {
    %c0_i32 = arith.constant 0 : i32
    %c0_i32_0 = arith.constant 0 : i32
    %c0_i32_1 = arith.constant 0 : i32
    return %c0_i32, %c0_i32_0 : i32, i32
  }
  func.func @transform_3(%arg0: i32, %arg1: i32) -> (i32, i32) {
    %c0_i32 = arith.constant 0 : i32
    %c0_i32_0 = arith.constant 0 : i32
    return %c0_i32, %arg1 : i32, i32
  }
  func.func @transform_4(%arg0: i32, %arg1: i32) -> (i32, i32) {
    %c0_i32 = arith.constant 0 : i32
    %c0_i32_0 = arith.constant 0 : i32
    %c0_i32_1 = arith.constant 0 : i32
    return %c0_i32, %c0_i32_0 : i32, i32
  }
  func.func @transform_5(%arg0: i32, %arg1: i32) -> (i32, i32, i32) {
    %c0_i32 = arith.constant 0 : i32
    %c0_i32_0 = arith.constant 0 : i32
    %c0_i32_1 = arith.constant 0 : i32
    return %arg0, %c0_i32, %c0_i32_0 : i32, i32, i32
  }
}

</mosaic_0001>

<bundles_post_ra>
// kernel: tpu_custom_call.1
= control target key start
LH: loop header
LB: loop body
LE: loop exit
PB: predicated region body
PF: predicated region fallthrough
CT: control target
= control target key end

     0   :  { %v635_v1 = vmov 0   ;;  %vm196_vm0 = vcmask 130048   ;;  %v636_v27 = vmov 0.0   ;;  %vm287_vm1 = vcmask 261120   ;;  %s781_s2 = inlined_call_operand.vmem [shape: bf16[128,256], index: 2, kind: input, shape index: {}]   ;;  %s782_s0 = inlined_call_operand.vmem [shape: bf16[1,16,128], index: 0, kind: input, shape index: {}]   ;;  %s783_s1 = inlined_call_operand.vmem [shape: bf16[32,16], index: 1, kind: input, shape index: {}]   ;;  %s784_s3 = inlined_call_operand.vmem [shape: bf16[12,32], index: 3, kind: input, shape index: {}]   ;;  %s785_s4 = inlined_call_operand.vmem [shape: bf16[256,96], index: 4, kind: input, shape index: {}]   ;;  %s786_s5 = inlined_call_operand.vmem [shape: f32[1,12,96], index: 5, kind: output, shape index: {}]  }
   0x1   :  { %v591_v0 = vld [vmem:[%s781_s2 + $0x4] ss:$8 sps:$4 sm:$0xff]   ;;  %165 = vmatprep.mubr.bf16.mxu0 %v635_v1  ;;  %235 = vmatprep.mubr.bf16.mxu1 %v635_v1  ;;  %v593_v2 = vld [vmem:[%s781_s2] ss:$8 sps:$4 sm:$0xff]   ;;  %v594_v3 = vld [vmem:[%s781_s2 + $0x14] ss:$8 sps:$4 sm:$0xff]  }
   0x2   :  { %133 = vmatprep.subr.bf16.mxu0 %v591_v0  ;;  %v596_v4 = vld [vmem:[%s781_s2 + $0x10] ss:$8 sps:$4 sm:$0xff]   ;;  %v597_v5 = vld [vmem:[%s781_s2 + $0x24] ss:$8 sps:$4 sm:$0xff]   ;;  %v599_v6 = vld [vmem:[%s781_s2 + $0x20] ss:$8 sps:$4 sm:$0xff]  }
   0x3   :  { %134 = vmatpush1.bf16.msra.mxu0 %v593_v2  ;;  %v600_v7 = vld [vmem:[%s781_s2 + $0x34] ss:$8 sps:$4 sm:$0xff]   ;;  %v602_v8 = vld [vmem:[%s781_s2 + $0x30] ss:$8 sps:$4 sm:$0xff]   ;;  %v603_v9 = vld [vmem:[%s781_s2 + $0x44] ss:$8 sps:$4 sm:$0xff]  }
   0x4   :  { %135 = vmatprep.subr.bf16.mxu0 %v594_v3  ;;  %v605_v10 = vld [vmem:[%s781_s2 + $0x40] ss:$8 sps:$4 sm:$0xff]   ;;  %v606_v11 = vld [vmem:[%s781_s2 + $0x54] ss:$8 sps:$4 sm:$0xff]   ;;  %v608_v12 = vld [vmem:[%s781_s2 + $0x50] ss:$8 sps:$4 sm:$0xff]  }
   0x5   :  { %v609_v13 = vld [vmem:[%s781_s2 + $0x64] ss:$8 sps:$4 sm:$0xff]   ;;  %v611_v14 = vld [vmem:[%s781_s2 + $0x60] ss:$8 sps:$4 sm:$0xff]   ;;  %v612_v15 = vld [vmem:[%s781_s2 + $0x74] ss:$8 sps:$4 sm:$0xff]  }
   0x6   :  { %v614_v16 = vld [vmem:[%s781_s2 + $0x70] ss:$8 sps:$4 sm:$0xff]   ;;  %v615_v17 = vld [vmem:[%s782_s0] sm:$0xff]   ;;  %v617_v25 = vld [vmem:[%s783_s1 + $0x8] sm:$0xff]   ;;  %27 = vst [vmem:[#allocation3 + $0x10] sm:$0xf] %v636_v27 }
   0x7   :  { %136 = vmatpush1.bf16.msra.mxu0 %v596_v4  ;;  %v616_v24 = vld [vmem:[%s783_s1] sm:$0xff]   ;;  %28 = vst [vmem:[#allocation3 + $0x18] sm:$0xf] %v636_v27  ;;  %v621_v29 = vld [vmem:[%s785_s4 + $0x48] sm:$0xff]   ;;  %v623_v31 = vld [vmem:[%s785_s4 + $0x50] sm:$0xff]   ;;  %vm520_vm2 = vcmask 785408  }
   0x8   :  { %137 = vmatprep.subr.bf16.mxu0 %v597_v5  ;;  %v619_v26 = vld [vmem:[%s785_s4 + $0x40] sm:$0xff]   ;;  %v622_v30 = vld [vmem:[%s785_s4 + $0x8] sm:$0xff]   ;;  %v624_v32 = vld [vmem:[%s785_s4 + $0x10] sm:$0xff]   ;;  %vm522_vm3 = vcmask 781312  }
   0x9   :  { %v620_v28 = vld [vmem:[%s785_s4] sm:$0xff]   ;;  %v625_v33 = vld [vmem:[%s785_s4 + $0x58] sm:$0xff]   ;;  %v629_v2 = vld [vmem:[%s785_s4 + $0x68] sm:$0xff]  }
   0xa   :  { %v626_v34 = vld [vmem:[%s785_s4 + $0x18] sm:$0xff]   ;;  %v618_v63 = vld [vmem:[%s784_s3] sm:$0x3f]   ;;  %v630_v3 = vld [vmem:[%s785_s4 + $0x28] sm:$0xff]  }
   0xb   :  { %138 = vmatpush1.bf16.msra.mxu0 %v599_v6  ;;  %v627_v0 = vld [vmem:[%s785_s4 + $0x60] sm:$0xff]   ;;  %v631_v4 = vld [vmem:[%s785_s4 + $0x70] sm:$0xff]   ;;  %v633_v6 = vld [vmem:[%s785_s4 + $0x78] sm:$0xff]  }
   0xc   :  { %139 = vmatprep.subr.bf16.mxu0 %v600_v7  ;;  %v632_v5 = vld [vmem:[%s785_s4 + $0x30] sm:$0xff]   ;;  %v634_v7 = vld [vmem:[%s785_s4 + $0x38] sm:$0xff]  }
   0xf   :  { %140 = vmatpush1.bf16.msra.mxu0 %v602_v8 }
  0x10   :  { %141 = vmatprep.subr.bf16.mxu0 %v603_v9  ;;  %v274_v9 = vld [vmem:[#allocation3 + $0x10] sm:$0xf] }
  0x13   :  { %142 = vmatpush1.bf16.msra.mxu0 %v605_v10 }
  0x14   :  { %143 = vmatprep.subr.bf16.mxu0 %v606_v11  ;;  %v275_v11 = vld [vmem:[#allocation3 + $0x18] sm:$0xf] }
  0x17   :  { %144 = vmatpush1.bf16.msra.mxu0 %v608_v12 }
  0x18   :  { %145 = vmatprep.subr.bf16.mxu0 %v609_v13 }
  0x1b   :  { %146 = vmatpush1.bf16.msra.mxu0 %v611_v14 }
  0x1c   :  { %147 = vmatprep.subr.bf16.mxu0 %v612_v15 }
  0x1f   :  { %148 = vmatpush1.bf16.msra.mxu0 %v614_v16 }
  0x22   :  { %166 = vmatmul.mubr.bf16.vlgmr.msra.gmra.mrb[0].mxu0 %v615_v17 }
  0x23   :  { %323 = vmatprep.mubr.bf16.mxu0 %v635_v1 }
  0xf5   :  { %v167_v18 = vpop.f32.mrb[0].mxu0 }
  0xf6   :  { %v169_v19 = vpop.f32.mrb[1].mxu0 }
  0xf7   :  { %v171_v20 = vpop.f32.mrb[2].mxu0 }
  0xf8   :  { %v176_v21 = vpack.c.bf16 %v171_v20, %v167_v18  ;;  %v173_v22 = vpop.f32.mrb[3].mxu0 }
  0xf9   :  { %v177_v23 = vpack.c.bf16 %v173_v22, %v169_v19 }
  0xfb   :  { %203 = vmatprep.subr.bf16.mxu1 %v177_v23 }
  0xfc   :  { %204 = vmatpush1.bf16.msra.mxu1 %v176_v21 }
  0xfd   :  { %567 = vmatprep.subr.bf16.mxu1 %v619_v26 }
  0xff   :  { %547 = vmatmul.mubr.msk.bf16.vlgmr.msra.gmra.mrb[0].mxu1 %vm196_vm0, %v616_v24 }
 0x100   :  { %245 = vmatprep.mubr.bf16.mxu1 %v635_v1  ;;  %568 = vmatpush3.bf16.msra.mxu1 %v620_v28  ;;  %v628_v1 = vld [vmem:[%s785_s4 + $0x20] sm:$0xff]  }
 0x101   :  { %569 = vmatprep.subr.bf16.mxu1 %v621_v29 }
 0x104   :  { %570 = vmatpush3.bf16.msra.mxu1 %v622_v30 }
 0x105   :  { %571 = vmatprep.subr.bf16.mxu1 %v623_v31 }
 0x107   :  { %548 = vmatmul.mubr.msk.bf16.gmra.mrb[4].mxu1 %vm196_vm0, %v617_v25 }
 0x108   :  { %572 = vmatpush3.bf16.msra.mxu1 %v624_v32 }
 0x109   :  { %573 = vmatprep.subr.bf16.mxu1 %v625_v33 }
 0x10c   :  { %574 = vmatpush3.bf16.msra.mxu1 %v626_v34 }
 0x10d   :  { %575 = vmatprep.subr.bf16.mxu1 %v627_v0 }
 0x110   :  { %576 = vmatpush3.bf16.msra.mxu1 %v628_v1 }
 0x111   :  { %577 = vmatprep.subr.bf16.mxu1 %v629_v2 }
 0x114   :  { %578 = vmatpush3.bf16.msra.mxu1 %v630_v3 }
 0x115   :  { %579 = vmatprep.subr.bf16.mxu1 %v631_v4 }
 0x118   :  { %580 = vmatpush3.bf16.msra.mxu1 %v632_v5 }
 0x119   :  { %581 = vmatprep.subr.bf16.mxu1 %v633_v6 }
 0x11c   :  { %582 = vmatpush3.bf16.msra.mxu1 %v634_v7 }
 0x1d2   :  { %v237_v35 = vpop.f32.mrb[0].mxu1 }
 0x1d3   :  { %v256_v36 = vmul.f32 0.01, %v237_v35  ;;  %v239_v37 = vpop.f32.mrb[1].mxu1 }
 0x1d4   :  { %v257_v38 = vmul.f32 0.01, %v239_v37  ;;  %v241_v39 = vpop.f32.mrb[2].mxu1 }
 0x1d5   :  { %v258_v40 = vmul.f32 0.01, %v241_v39  ;;  %v243_v41 = vpop.f32.mrb[3].mxu1  ;;  %v264_v43 = vmax.f32 %v237_v35, %v256_v36 }
 0x1d6   :  { %v259_v42 = vmul.f32 0.01, %v243_v41  ;;  %v265_v45 = vmax.f32 %v239_v37, %v257_v38 }
 0x1d7   :  { %v266_v44 = vmax.f32 %v241_v39, %v258_v40 }
 0x1d8   :  { %v267_v46 = vmax.f32 %v243_v41, %v259_v42 }
 0x1d9   :  { %v278_v47 = vpack.c.bf16 %v266_v44, %v264_v43 }
 0x1da   :  { %v279_v48 = vpack.c.bf16 %v267_v46, %v265_v45  ;;  %v247_v49 = vpop.f32.mrb[4].mxu1 }
 0x1db   :  { %v260_v50 = vmul.f32 0.01, %v247_v49  ;;  %v249_v51 = vpop.f32.mrb[5].mxu1 }
 0x1dc   :  { %v261_v52 = vmul.f32 0.01, %v249_v51  ;;  %v251_v53 = vpop.f32.mrb[6].mxu1  ;;  %291 = vmatprep.subr.bf16.mxu0 %v279_v48 }
 0x1dd   :  { %v262_v54 = vmul.f32 0.01, %v251_v53  ;;  %v253_v55 = vpop.f32.mrb[7].mxu1  ;;  %292 = vmatpush1.bf16.msra.mxu0 %v278_v47  ;;  %v268_v57 = vmax.f32 %v247_v49, %v260_v50 }
 0x1de   :  { %v263_v56 = vmul.f32 0.01, %v253_v55  ;;  %v269_v59 = vmax.f32 %v249_v51, %v261_v52 }
 0x1df   :  { %v270_v58 = vmax.f32 %v251_v53, %v262_v54 }
 0x1e0   :  { %v271_v60 = vmax.f32 %v253_v55, %v263_v56 }
 0x1e1   :  { %v280_v61 = vpack.c.bf16 %v270_v58, %v268_v57 }
 0x1e2   :  { %v281_v62 = vpack.c.bf16 %v271_v60, %v269_v59 }
 0x1e4   :  { %293 = vmatprep.subr.bf16.mxu0 %v281_v62 }
 0x1e5   :  { %294 = vmatpush1.bf16.msra.mxu0 %v280_v61 }
 0x1e8   :  { %550 = vmatmul.mubr.msk.bf16.vlgmr.msra.gmra.mrb[4].mxu0 %vm287_vm1, %v618_v63 }
 0x2bb   :  { %v325_v8 = vpop.f32.mrb[4].mxu0 }
 0x2bc   :  { %v327_v10 = vpop.f32.mrb[5].mxu0 }
 0x2bd   :  { %v329_v12 = vpop.f32.mrb[6].mxu0 }
 0x2be   :  { %v336_v13 = vadd.f32 %v329_v12, %v274_v9  ;;  %v331_v14 = vpop.f32.mrb[7].mxu0 }
 0x2bf   :  { %v337_v15 = vadd.f32 %v331_v14, %v275_v11 }
 0x2c0   :  { %340 = vst [vmem:[#allocation3 + $0x10] sm:$0xf] %v336_v13 }
 0x2c1   :  { %341 = vst [vmem:[#allocation3 + $0x18] sm:$0xf] %v337_v15 }
 0x2c7   :  { %v347_v16 = vld [vmem:[#allocation3 + $0x10] sm:$0xf] }
 0x2c8   :  { %v348_v17 = vld [vmem:[#allocation3 + $0x18] sm:$0xf]  ;;  %v349_v19 = vpack.c.bf16 %v347_v16, %v325_v8 }
 0x2c9   :  { %v350_v18 = vpack.c.bf16 %v348_v17, %v327_v10 }
 0x2cb   :  { %511 = vmatprep.mubr.bf16.mxu1 %v350_v18 }
 0x2cc   :  { %512 = vmatmul.mubr.bf16.vlgmr.msra.gmra.mrb[8].mxu1 %v349_v19 }
 0x39f   :  { %v583_v20 = vpop.f32.mrb[8].mxu1 }
 0x3a0   :  { %v584_v21 = vpop.f32.mrb[9].mxu1 }
 0x3a1   :  { %v585_v22 = vadd.f32 %v584_v21, %v583_v20  ;;  %v586_v23 = vpop.f32.mrb[10].mxu1 }
 0x3a2   :  { %v587_v24 = vpop.f32.mrb[11].mxu1 }
 0x3a3   :  { %521 = vst.msk [vmem:[%s786_s5] sm:$0xff] %vm520_vm2, %v585_v22  ;;  %v588_v25 = vadd.f32 %v587_v24, %v586_v23 }
 0x3a5   :  { %523 = vst.msk [vmem:[%s786_s5 + $0x8] sm:$0xf] %vm522_vm3, %v588_v25 }

</bundles_post_ra>
